<compile_context>
chip_gen: v7x
topology: tpu7x:2x2x1
jax: 0.10.0
libtpu: 0.0.40
codegen_flags: <defaults>
</compile_context>

<pallas_src>
from functools import partial

import jax
import jax.numpy as jnp
from jax.experimental import pallas as pl
from jax.experimental.pallas import tpu as pltpu


def _round_up(x, m):
    return ((x + m - 1) // m) * m


def _vap_kernel(x_ref, w1t_ref, w2t_ref, wpt_ref, bp_ref, out_ref, *,
                n_segment, vap_level, d, chunk, n_chunks, rem):
    # Resident (single-buffered, constant-index) weights.
    w1t = w1t_ref[...]            # (T, 4T)      f32
    w2t = w2t_ref[...]            # (4T, T)      f32
    wpt = wpt_ref[...]            # (d, NC_pad)  f32
    bp = bp_ref[...]              # (1, NC_pad)  f32

    inv_d = jnp.float32(1.0 / d)
    half = n_segment // 2

    def process(r0, rows):
        rsl = pl.ds(r0, rows)

        # ---- multi-scale MaxPool3d(dilation) as a pairwise-max tree.
        # Top level reads straight from the ref (full block never materialized);
        # the tree stays in the streaming dtype (max is exact in bf16/f32).
        cur = jnp.maximum(x_ref[rsl, :half, :], x_ref[rsl, half:, :])  # (rows, n_seg/2, d)
        pooled = [None] * vap_level
        pooled[vap_level - 1] = cur
        for level in range(vap_level - 2, -1, -1):
            ts = 2 ** level
            cur = jnp.maximum(cur[:, :ts, :], cur[:, ts:2 * ts, :])    # (rows, ts, d)
            pooled[level] = cur

        # ---- GAP over features -> (rows, T) descriptor (cat order ts = 1, 2, 4, ...)
        w0 = jnp.concatenate(
            [jnp.sum(p.astype(jnp.float32), axis=2) * inv_d for p in pooled], axis=1)

        # ---- TES excitation MLP (batched GEMMs) + exact softmax over timescales.
        # NOTE: T / 4T are tiny; if the TES MLP is ever scaled up, pre-pad these
        # dims to 128-multiples in the wrapper.
        h = jnp.maximum(jnp.dot(w0, w1t, preferred_element_type=jnp.float32), 0.0)
        logits = jnp.dot(h, w2t, preferred_element_type=jnp.float32)
        m = jnp.max(logits, axis=1, keepdims=True)
        e = jnp.exp(logits - m)
        attn = e / jnp.sum(e, axis=1, keepdims=True)                   # exact division

        # ---- attention-weighted sum over timescales, per level (no (rows,T,d) concat)
        feat = None
        off = 0
        for level in range(vap_level):
            ts = 2 ** level
            a = attn[:, off:off + ts]                                  # (rows, ts)
            contrib = jnp.sum(pooled[level].astype(jnp.float32) * a[:, :, None], axis=1)
            feat = contrib if feat is None else feat + contrib
            off += ts

        # TODO(synk): dropout is identity (eval-mode semantics); training-mode masking omitted.

        # ---- prediction head (lane-dense padded classes), store this chunk.
        out_ref[rsl, :] = jnp.dot(feat, wpt, preferred_element_type=jnp.float32) + bp

    if n_chunks == 1 and rem == 0:
        process(0, chunk)                      # single static chunk
    else:
        if n_chunks > 0:
            @pl.loop(0, n_chunks)
            def _(c):
                process(pl.multiple_of(c * chunk, chunk), chunk)
        if rem > 0:
            process(n_chunks * chunk, rem)     # static remainder chunk


def vap_forward(x, w1, w2, wp, bp, n_segment):
    """x: (N*n_segment, d), float32 or bfloat16.  Returns (N, num_class) float32."""
    NT, d = x.shape
    assert NT % n_segment == 0
    assert n_segment >= 2 and (n_segment & (n_segment - 1)) == 0, \
        "n_segment must be a power of two"
    N = NT // n_segment
    vap_level = n_segment.bit_length() - 1          # exact log2
    T = n_segment - 1                               # sum_{i<L} 2**i
    num_class = wp.shape[0]

    # Stream activations in the caller's dtype (bf16 halves HBM traffic); no upcast copy.
    x3 = x.reshape(N, n_segment, d)

    # Lane-dense padded prediction head (zero-padded classes sliced off afterwards).
    nc_pad = _round_up(num_class, 128)
    wpt = jnp.zeros((d, nc_pad), jnp.float32).at[:, :num_class].set(wp.T.astype(jnp.float32))
    bp2 = jnp.zeros((1, nc_pad), jnp.float32).at[:, :num_class].set(bp.astype(jnp.float32))
    w1t = w1.T.astype(jnp.float32)                  # (T, 4T)
    w2t = w2.T.astype(jnp.float32)                  # (4T, T)

    # ---------- generation-aware tile sizing ----------
    try:
        vmem_cap = int(getattr(pltpu.get_tpu_info(), "vmem_capacity_bytes",
                               64 * 1024 * 1024))
    except Exception:
        vmem_cap = 64 * 1024 * 1024                 # v7x-conservative fallback
    budget = max(12 * 1024 * 1024, (3 * vmem_cap) // 8)

    CH = 64                                         # in-kernel row sub-chunk (vreg bound)
    x_bytes = jnp.dtype(x.dtype).itemsize
    resident = 4 * (8 * T * T + d * nc_pad + nc_pad)             # single-buffered weights
    per_row = 2 * x_bytes * n_segment * d + 2 * 4 * nc_pad       # double-buffered in/out
    chunk_tmp = 4 * CH * (2 * n_segment * d + 2 * d + 8 * T + nc_pad)  # live temporaries
    tb = (budget - resident - chunk_tmp) // max(per_row, 1)
    tb = max(CH, (tb // CH) * CH)                   # multiple of the sub-chunk
    tb = min(tb, 1024)                              # diminishing returns past ~1K rows/step
    tb = min(tb, max(CH, _round_up(-(-N // 2), CH)))  # >= 2 grid steps for v7x megacore
    if N <= tb:
        tb = N                                      # single exact block: no pad / partials
    n_blocks = -(-N // tb)      # partial last block (if any): reads padded with garbage
                                # rows, OOB writes dropped; rows are independent -> exact.
    n_chunks, rem = divmod(tb, CH)

    footprint = resident + tb * per_row + chunk_tmp
    vmem_limit = int(min((7 * vmem_cap) // 8, max(2 * footprint, 16 * 1024 * 1024)))

    kernel = partial(_vap_kernel, n_segment=n_segment, vap_level=vap_level, d=d,
                     chunk=CH, n_chunks=n_chunks, rem=rem)

    def run(single_buffer_weights):
        def wspec(shape):
            idx = lambda n, _z=(0,) * len(shape): _z
            if single_buffer_weights:
                try:
                    return pl.BlockSpec(shape, idx, pipeline_mode=pl.Buffered(1))
                except TypeError:                   # older BlockSpec without pipeline_mode
                    return pl.BlockSpec(shape, idx)
            return pl.BlockSpec(shape, idx)

        return pl.pallas_call(
            kernel,
            out_shape=jax.ShapeDtypeStruct((N, nc_pad), jnp.float32),
            grid_spec=pltpu.PrefetchScalarGridSpec(
                num_scalar_prefetch=0,
                grid=(n_blocks,),
                in_specs=[
                    pl.BlockSpec((tb, n_segment, d), lambda n: (n, 0, 0)),
                    wspec((T, 4 * T)),
                    wspec((4 * T, T)),
                    wspec((d, nc_pad)),
                    wspec((1, nc_pad)),
                ],
                out_specs=pl.BlockSpec((tb, nc_pad), lambda n: (n, 0)),
            ),
            compiler_params=pltpu.CompilerParams(
                dimension_semantics=("parallel",),
                vmem_limit_bytes=vmem_limit,
            ),
        )(x3, w1t, w2t, wpt, bp2)

    try:
        out = run(True)
    except Exception:
        out = run(False)        # compatibility fallback: double-buffered weights
    return out[:, :num_class]


def vap_reference(x, w1, w2, wp, bp, n_segment):
    """Pure-JAX reference mirroring the PyTorch forward (eval mode)."""
    NT, d = x.shape
    N = NT // n_segment
    vap_level = n_segment.bit_length() - 1
    xs = x.astype(jnp.float32).reshape(N, n_segment, d)
    pooled = []
    for i in range(vap_level):
        ts = 2 ** i
        pooled.append(jnp.max(xs.reshape(N, n_segment // ts, ts, d), axis=1))
    P = jnp.concatenate(pooled, axis=1)            # (N, T, d)
    w0 = jnp.mean(P, axis=2)                       # (N, T)
    h = jnp.maximum(w0 @ w1.T, 0.0)
    attn = jax.nn.softmax(h @ w2.T, axis=1)        # (N, T)
    feat = jnp.sum(P * attn[:, :, None], axis=1)   # (N, d)
    return feat @ wp.T + bp


if __name__ == "__main__":
    # small shapes consistent with the module
    n_segment = 8
    feature_dim = 32
    num_class = 10
    batch = 2

    T = n_segment - 1                               # 7

    key = jax.random.PRNGKey(0)
    kx, k1, k2, kp = jax.random.split(key, 4)

    x = jax.random.normal(kx, (batch * n_segment, feature_dim), dtype=jnp.float32)

    # deterministic parameter init matching nn.init.normal_(w, 0, 0.001), bias = 0
    w1 = 0.001 * jax.random.normal(k1, (4 * T, T), dtype=jnp.float32)   # TES linear 1 (no bias)
    w2 = 0.001 * jax.random.normal(k2, (T, 4 * T), dtype=jnp.float32)   # TES linear 2 (no bias)
    wp = 0.001 * jax.random.normal(kp, (num_class, feature_dim), dtype=jnp.float32)
    bp = jnp.zeros((num_class,), dtype=jnp.float32)                     # pred bias

    # f32 activation stream
    out = jax.block_until_ready(vap_forward(x, w1, w2, wp, bp, n_segment))
    ref = vap_reference(x, w1, w2, wp, bp, n_segment)
    assert out.shape == (batch, num_class)
    assert jnp.allclose(out, ref, atol=5e-5, rtol=1e-3), "f32 mismatch vs reference"

    # bf16 activation stream (halved HBM traffic path); weights stay f32.
    x_bf16 = x.astype(jnp.bfloat16)
    out_bf = jax.block_until_ready(vap_forward(x_bf16, w1, w2, wp, bp, n_segment))
    ref_bf = vap_reference(x_bf16, w1, w2, wp, bp, n_segment)
    assert jnp.allclose(out_bf, ref_bf, atol=1e-4, rtol=5e-3), "bf16 mismatch vs reference"

    print("KERNEL_OK")
</pallas_src>

<mosaic_0001>
module attributes {stable_mosaic.version = 11 : i64} {
  func.func @_vap_kernel(%arg0: i32, %arg1: memref<2x8x32xf32, #tpu.memory_space<vmem>>, %arg2: memref<7x28xf32, #tpu.memory_space<vmem>>, %arg3: memref<28x7xf32, #tpu.memory_space<vmem>>, %arg4: memref<32x128xf32, #tpu.memory_space<vmem>>, %arg5: memref<1x128xf32, #tpu.memory_space<vmem>>, %arg6: memref<2x128xf32, #tpu.memory_space<vmem>>) attributes {dimension_semantics = [#tpu.dimension_semantics<parallel>], iteration_bounds = array<i64: 1>, scalar_prefetch = 0 : i64, scratch_operands = 0 : i64, tpu.core_type = #tpu.core_type<tc>, window_params = [{transform_indices = @transform_0, window_bounds = array<i64: 2, 8, 32>}, {pipeline_mode = #tpu.pipeline_mode<synchronous>, transform_indices = @transform_1, window_bounds = array<i64: 7, 28>}, {pipeline_mode = #tpu.pipeline_mode<synchronous>, transform_indices = @transform_2, window_bounds = array<i64: 28, 7>}, {pipeline_mode = #tpu.pipeline_mode<synchronous>, transform_indices = @transform_3, window_bounds = array<i64: 32, 128>}, {pipeline_mode = #tpu.pipeline_mode<synchronous>, transform_indices = @transform_4, window_bounds = array<i64: 1, 128>}, {transform_indices = @transform_5, window_bounds = array<i64: 2, 128>}]} {
    %c0 = arith.constant 0 : index
    %c0_0 = arith.constant 0 : index
    %0 = vector.load %arg2[%c0, %c0_0] : memref<7x28xf32, #tpu.memory_space<vmem>>, vector<7x28xf32>
    %c0_1 = arith.constant 0 : index
    %c0_2 = arith.constant 0 : index
    %1 = vector.load %arg3[%c0_1, %c0_2] : memref<28x7xf32, #tpu.memory_space<vmem>>, vector<28x7xf32>
    %c0_3 = arith.constant 0 : index
    %c0_4 = arith.constant 0 : index
    %2 = vector.load %arg4[%c0_3, %c0_4] : memref<32x128xf32, #tpu.memory_space<vmem>>, vector<32x128xf32>
    %c0_5 = arith.constant 0 : index
    %c0_6 = arith.constant 0 : index
    %3 = vector.load %arg5[%c0_5, %c0_6] : memref<1x128xf32, #tpu.memory_space<vmem>>, vector<1x128xf32>
    %c0_7 = arith.constant 0 : index
    %c0_8 = arith.constant 0 : index
    %c0_9 = arith.constant 0 : index
    %4 = vector.load %arg1[%c0_7, %c0_8, %c0_9] : memref<2x8x32xf32, #tpu.memory_space<vmem>>, vector<2x4x32xf32>
    %c0_10 = arith.constant 0 : index
    %c4 = arith.constant 4 : index
    %c0_11 = arith.constant 0 : index
    %5 = vector.load %arg1[%c0_10, %c4, %c0_11] : memref<2x8x32xf32, #tpu.memory_space<vmem>>, vector<2x4x32xf32>
    %6 = arith.maximumf %4, %5 : vector<2x4x32xf32>
    %7 = vector.extract_strided_slice %6 {offsets = [0, 0, 0], sizes = [2, 2, 32], strides = [1, 1, 1]} : vector<2x4x32xf32> to vector<2x2x32xf32>
    %8 = vector.extract_strided_slice %6 {offsets = [0, 2, 0], sizes = [2, 2, 32], strides = [1, 1, 1]} : vector<2x4x32xf32> to vector<2x2x32xf32>
    %9 = arith.maximumf %7, %8 : vector<2x2x32xf32>
    %10 = vector.extract_strided_slice %9 {offsets = [0, 0, 0], sizes = [2, 1, 32], strides = [1, 1, 1]} : vector<2x2x32xf32> to vector<2x1x32xf32>
    %11 = vector.extract_strided_slice %9 {offsets = [0, 1, 0], sizes = [2, 1, 32], strides = [1, 1, 1]} : vector<2x2x32xf32> to vector<2x1x32xf32>
    %12 = arith.maximumf %10, %11 : vector<2x1x32xf32>
    %cst = arith.constant dense<0.000000e+00> : vector<2x1xf32>
    %13 = vector.multi_reduction <add>, %12, %cst [2] : vector<2x1x32xf32> to vector<2x1xf32>
    %cst_12 = arith.constant 3.125000e-02 : f32
    %14 = vector.broadcast %cst_12 : f32 to vector<2x1xf32>
    %15 = arith.mulf %13, %14 : vector<2x1xf32>
    %cst_13 = arith.constant dense<0.000000e+00> : vector<2x2xf32>
    %16 = vector.multi_reduction <add>, %9, %cst_13 [2] : vector<2x2x32xf32> to vector<2x2xf32>
    %cst_14 = arith.constant 3.125000e-02 : f32
    %17 = vector.broadcast %cst_14 : f32 to vector<2x2xf32>
    %18 = arith.mulf %16, %17 : vector<2x2xf32>
    %cst_15 = arith.constant dense<0.000000e+00> : vector<2x4xf32>
    %19 = vector.multi_reduction <add>, %6, %cst_15 [2] : vector<2x4x32xf32> to vector<2x4xf32>
    %cst_16 = arith.constant 3.125000e-02 : f32
    %20 = vector.broadcast %cst_16 : f32 to vector<2x4xf32>
    %21 = arith.mulf %19, %20 : vector<2x4xf32>
    %22 = tpu.concatenate %15, %18, %21 in 1 : vector<2x1xf32>, vector<2x2xf32>, vector<2x4xf32> -> vector<2x7xf32>
    %cst_17 = arith.constant dense<0.000000e+00> : vector<2x28xf32>
    %23 = tpu.matmul %22, %0, %cst_17 {dimension_numbers = #tpu.dot_dimension_numbers<[1], [0], [0], [1], [0, 0, 1, 1], [], []>} : vector<2x7xf32>, vector<7x28xf32>, vector<2x28xf32> -> vector<2x28xf32>
    %cst_18 = arith.constant 0.000000e+00 : f32
    %24 = vector.broadcast %cst_18 : f32 to vector<2x28xf32>
    %25 = arith.maximumf %23, %24 : vector<2x28xf32>
    %cst_19 = arith.constant dense<0.000000e+00> : vector<2x7xf32>
    %26 = tpu.matmul %25, %1, %cst_19 {dimension_numbers = #tpu.dot_dimension_numbers<[1], [0], [0], [1], [0, 0, 1, 1], [], []>} : vector<2x28xf32>, vector<28x7xf32>, vector<2x7xf32> -> vector<2x7xf32>
    %cst_20 = arith.constant dense<0xFF800000> : vector<2xf32>
    %27 = vector.multi_reduction <maximumf>, %26, %cst_20 [1] : vector<2x7xf32> to vector<2xf32>
    %28 = vector.shape_cast %27 : vector<2xf32> to vector<2x1xf32>
    %29 = vector.broadcast %28 : vector<2x1xf32> to vector<2x7xf32>
    %30 = arith.subf %26, %29 : vector<2x7xf32>
    %31 = math.exp %30 : vector<2x7xf32>
    %cst_21 = arith.constant dense<0.000000e+00> : vector<2xf32>
    %32 = vector.multi_reduction <add>, %31, %cst_21 [1] : vector<2x7xf32> to vector<2xf32>
    %33 = vector.shape_cast %32 : vector<2xf32> to vector<2x1xf32>
    %34 = vector.broadcast %33 : vector<2x1xf32> to vector<2x7xf32>
    %35 = arith.divf %31, %34 : vector<2x7xf32>
    %36 = vector.extract_strided_slice %35 {offsets = [0, 0], sizes = [2, 1], strides = [1, 1]} : vector<2x7xf32> to vector<2x1xf32>
    %37 = vector.shape_cast %36 : vector<2x1xf32> to vector<2x1x1xf32>
    %38 = vector.broadcast %37 : vector<2x1x1xf32> to vector<2x1x32xf32>
    %39 = arith.mulf %12, %38 : vector<2x1x32xf32>
    %cst_22 = arith.constant dense<0.000000e+00> : vector<2x32xf32>
    %40 = vector.multi_reduction <add>, %39, %cst_22 [1] : vector<2x1x32xf32> to vector<2x32xf32>
    %41 = vector.extract_strided_slice %35 {offsets = [0, 1], sizes = [2, 2], strides = [1, 1]} : vector<2x7xf32> to vector<2x2xf32>
    %42 = vector.shape_cast %41 : vector<2x2xf32> to vector<2x2x1xf32>
    %43 = vector.broadcast %42 : vector<2x2x1xf32> to vector<2x2x32xf32>
    %44 = arith.mulf %9, %43 : vector<2x2x32xf32>
    %cst_23 = arith.constant dense<0.000000e+00> : vector<2x32xf32>
    %45 = vector.multi_reduction <add>, %44, %cst_23 [1] : vector<2x2x32xf32> to vector<2x32xf32>
    %46 = arith.addf %40, %45 : vector<2x32xf32>
    %47 = vector.extract_strided_slice %35 {offsets = [0, 3], sizes = [2, 4], strides = [1, 1]} : vector<2x7xf32> to vector<2x4xf32>
    %48 = vector.shape_cast %47 : vector<2x4xf32> to vector<2x4x1xf32>
    %49 = vector.broadcast %48 : vector<2x4x1xf32> to vector<2x4x32xf32>
    %50 = arith.mulf %6, %49 : vector<2x4x32xf32>
    %cst_24 = arith.constant dense<0.000000e+00> : vector<2x32xf32>
    %51 = vector.multi_reduction <add>, %50, %cst_24 [1] : vector<2x4x32xf32> to vector<2x32xf32>
    %52 = arith.addf %46, %51 : vector<2x32xf32>
    %cst_25 = arith.constant dense<0.000000e+00> : vector<2x128xf32>
    %53 = tpu.matmul %52, %2, %cst_25 {dimension_numbers = #tpu.dot_dimension_numbers<[1], [0], [0], [1], [0, 0, 1, 1], [], []>} : vector<2x32xf32>, vector<32x128xf32>, vector<2x128xf32> -> vector<2x128xf32>
    %54 = vector.broadcast %3 : vector<1x128xf32> to vector<2x128xf32>
    %55 = arith.addf %53, %54 : vector<2x128xf32>
    %c0_26 = arith.constant 0 : index
    %c0_27 = arith.constant 0 : index
    %56 = vector.load %arg6[%c0_26, %c0_27] : memref<2x128xf32, #tpu.memory_space<vmem>>, vector<2x128xf32>
    tpu.vector_store %arg6[%c0_26, %c0_27], %55 {strides = array<i32>} : memref<2x128xf32, #tpu.memory_space<vmem>>, vector<2x128xf32>,
    return
  }
  func.func @transform_0(%arg0: i32) -> (i32, i32, i32) {
    %c0_i32 = arith.constant 0 : i32
    %c0_i32_0 = arith.constant 0 : i32
    %c0_i32_1 = arith.constant 0 : i32
    return %arg0, %c0_i32, %c0_i32_0 : i32, i32, i32
  }
  func.func @transform_1(%arg0: i32) -> (i32, i32) {
    %c0_i32 = arith.constant 0 : i32
    %c0_i32_0 = arith.constant 0 : i32
    %c0_i32_1 = arith.constant 0 : i32
    return %c0_i32, %c0_i32_0 : i32, i32
  }
  func.func @transform_2(%arg0: i32) -> (i32, i32) {
    %c0_i32 = arith.constant 0 : i32
    %c0_i32_0 = arith.constant 0 : i32
    %c0_i32_1 = arith.constant 0 : i32
    return %c0_i32, %c0_i32_0 : i32, i32
  }
  func.func @transform_3(%arg0: i32) -> (i32, i32) {
    %c0_i32 = arith.constant 0 : i32
    %c0_i32_0 = arith.constant 0 : i32
    %c0_i32_1 = arith.constant 0 : i32
    return %c0_i32, %c0_i32_0 : i32, i32
  }
  func.func @transform_4(%arg0: i32) -> (i32, i32) {
    %c0_i32 = arith.constant 0 : i32
    %c0_i32_0 = arith.constant 0 : i32
    %c0_i32_1 = arith.constant 0 : i32
    return %c0_i32, %c0_i32_0 : i32, i32
  }
  func.func @transform_5(%arg0: i32) -> (i32, i32) {
    %c0_i32 = arith.constant 0 : i32
    %c0_i32_0 = arith.constant 0 : i32
    return %arg0, %c0_i32 : i32, i32
  }
}

module attributes {stable_mosaic.version = 11 : i64} {
  func.func @_vap_kernel(%arg0: i32, %arg1: memref<2x8x32xf32, #tpu.memory_space<vmem>>, %arg2: memref<7x28xf32, #tpu.memory_space<vmem>>, %arg3: memref<28x7xf32, #tpu.memory_space<vmem>>, %arg4: memref<32x128xf32, #tpu.memory_space<vmem>>, %arg5: memref<1x128xf32, #tpu.memory_space<vmem>>, %arg6: memref<2x128xf32, #tpu.memory_space<vmem>>) attributes {dimension_semantics = [#tpu.dimension_semantics<parallel>], iteration_bounds = array<i64: 1>, scalar_prefetch = 0 : i64, scratch_operands = 0 : i64, tpu.core_type = #tpu.core_type<tc>, window_params = [{transform_indices = @transform_0, window_bounds = array<i64: 2, 8, 32>}, {pipeline_mode = #tpu.pipeline_mode<synchronous>, transform_indices = @transform_1, window_bounds = array<i64: 7, 28>}, {pipeline_mode = #tpu.pipeline_mode<synchronous>, transform_indices = @transform_2, window_bounds = array<i64: 28, 7>}, {pipeline_mode = #tpu.pipeline_mode<synchronous>, transform_indices = @transform_3, window_bounds = array<i64: 32, 128>}, {pipeline_mode = #tpu.pipeline_mode<synchronous>, transform_indices = @transform_4, window_bounds = array<i64: 1, 128>}, {transform_indices = @transform_5, window_bounds = array<i64: 2, 128>}]} {
    %c0 = arith.constant 0 : index
    %c0_0 = arith.constant 0 : index
    %0 = vector.load %arg2[%c0, %c0_0] : memref<7x28xf32, #tpu.memory_space<vmem>>, vector<7x28xf32>
    %c0_1 = arith.constant 0 : index
    %c0_2 = arith.constant 0 : index
    %1 = vector.load %arg3[%c0_1, %c0_2] : memref<28x7xf32, #tpu.memory_space<vmem>>, vector<28x7xf32>
    %c0_3 = arith.constant 0 : index
    %c0_4 = arith.constant 0 : index
    %2 = vector.load %arg4[%c0_3, %c0_4] : memref<32x128xf32, #tpu.memory_space<vmem>>, vector<32x128xf32>
    %c0_5 = arith.constant 0 : index
    %c0_6 = arith.constant 0 : index
    %3 = vector.load %arg5[%c0_5, %c0_6] : memref<1x128xf32, #tpu.memory_space<vmem>>, vector<1x128xf32>
    %c0_7 = arith.constant 0 : index
    %c0_8 = arith.constant 0 : index
    %c0_9 = arith.constant 0 : index
    %4 = vector.load %arg1[%c0_7, %c0_8, %c0_9] : memref<2x8x32xf32, #tpu.memory_space<vmem>>, vector<2x4x32xf32>
    %c0_10 = arith.constant 0 : index
    %c4 = arith.constant 4 : index
    %c0_11 = arith.constant 0 : index
    %5 = vector.load %arg1[%c0_10, %c4, %c0_11] : memref<2x8x32xf32, #tpu.memory_space<vmem>>, vector<2x4x32xf32>
    %6 = arith.maximumf %4, %5 : vector<2x4x32xf32>
    %7 = vector.extract_strided_slice %6 {offsets = [0, 0, 0], sizes = [2, 2, 32], strides = [1, 1, 1]} : vector<2x4x32xf32> to vector<2x2x32xf32>
    %8 = vector.extract_strided_slice %6 {offsets = [0, 2, 0], sizes = [2, 2, 32], strides = [1, 1, 1]} : vector<2x4x32xf32> to vector<2x2x32xf32>
    %9 = arith.maximumf %7, %8 : vector<2x2x32xf32>
    %10 = vector.extract_strided_slice %9 {offsets = [0, 0, 0], sizes = [2, 1, 32], strides = [1, 1, 1]} : vector<2x2x32xf32> to vector<2x1x32xf32>
    %11 = vector.extract_strided_slice %9 {offsets = [0, 1, 0], sizes = [2, 1, 32], strides = [1, 1, 1]} : vector<2x2x32xf32> to vector<2x1x32xf32>
    %12 = arith.maximumf %10, %11 : vector<2x1x32xf32>
    %cst = arith.constant dense<0.000000e+00> : vector<2x1xf32>
    %13 = vector.multi_reduction <add>, %12, %cst [2] : vector<2x1x32xf32> to vector<2x1xf32>
    %cst_12 = arith.constant 3.125000e-02 : f32
    %14 = vector.broadcast %cst_12 : f32 to vector<2x1xf32>
    %15 = arith.mulf %13, %14 : vector<2x1xf32>
    %cst_13 = arith.constant dense<0.000000e+00> : vector<2x2xf32>
    %16 = vector.multi_reduction <add>, %9, %cst_13 [2] : vector<2x2x32xf32> to vector<2x2xf32>
    %cst_14 = arith.constant 3.125000e-02 : f32
    %17 = vector.broadcast %cst_14 : f32 to vector<2x2xf32>
    %18 = arith.mulf %16, %17 : vector<2x2xf32>
    %cst_15 = arith.constant dense<0.000000e+00> : vector<2x4xf32>
    %19 = vector.multi_reduction <add>, %6, %cst_15 [2] : vector<2x4x32xf32> to vector<2x4xf32>
    %cst_16 = arith.constant 3.125000e-02 : f32
    %20 = vector.broadcast %cst_16 : f32 to vector<2x4xf32>
    %21 = arith.mulf %19, %20 : vector<2x4xf32>
    %22 = tpu.concatenate %15, %18, %21 in 1 : vector<2x1xf32>, vector<2x2xf32>, vector<2x4xf32> -> vector<2x7xf32>
    %cst_17 = arith.constant dense<0.000000e+00> : vector<2x28xf32>
    %23 = tpu.matmul %22, %0, %cst_17 {dimension_numbers = #tpu.dot_dimension_numbers<[1], [0], [0], [1], [0, 0, 1, 1], [], []>} : vector<2x7xf32>, vector<7x28xf32>, vector<2x28xf32> -> vector<2x28xf32>
    %cst_18 = arith.constant 0.000000e+00 : f32
    %24 = vector.broadcast %cst_18 : f32 to vector<2x28xf32>
    %25 = arith.maximumf %23, %24 : vector<2x28xf32>
    %cst_19 = arith.constant dense<0.000000e+00> : vector<2x7xf32>
    %26 = tpu.matmul %25, %1, %cst_19 {dimension_numbers = #tpu.dot_dimension_numbers<[1], [0], [0], [1], [0, 0, 1, 1], [], []>} : vector<2x28xf32>, vector<28x7xf32>, vector<2x7xf32> -> vector<2x7xf32>
    %cst_20 = arith.constant dense<0xFF800000> : vector<2xf32>
    %27 = vector.multi_reduction <maximumf>, %26, %cst_20 [1] : vector<2x7xf32> to vector<2xf32>
    %28 = vector.shape_cast %27 : vector<2xf32> to vector<2x1xf32>
    %29 = vector.broadcast %28 : vector<2x1xf32> to vector<2x7xf32>
    %30 = arith.subf %26, %29 : vector<2x7xf32>
    %31 = math.exp %30 : vector<2x7xf32>
    %cst_21 = arith.constant dense<0.000000e+00> : vector<2xf32>
    %32 = vector.multi_reduction <add>, %31, %cst_21 [1] : vector<2x7xf32> to vector<2xf32>
    %33 = vector.shape_cast %32 : vector<2xf32> to vector<2x1xf32>
    %34 = vector.broadcast %33 : vector<2x1xf32> to vector<2x7xf32>
    %35 = arith.divf %31, %34 : vector<2x7xf32>
    %36 = vector.extract_strided_slice %35 {offsets = [0, 0], sizes = [2, 1], strides = [1, 1]} : vector<2x7xf32> to vector<2x1xf32>
    %37 = vector.shape_cast %36 : vector<2x1xf32> to vector<2x1x1xf32>
    %38 = vector.broadcast %37 : vector<2x1x1xf32> to vector<2x1x32xf32>
    %39 = arith.mulf %12, %38 : vector<2x1x32xf32>
    %cst_22 = arith.constant dense<0.000000e+00> : vector<2x32xf32>
    %40 = vector.multi_reduction <add>, %39, %cst_22 [1] : vector<2x1x32xf32> to vector<2x32xf32>
    %41 = vector.extract_strided_slice %35 {offsets = [0, 1], sizes = [2, 2], strides = [1, 1]} : vector<2x7xf32> to vector<2x2xf32>
    %42 = vector.shape_cast %41 : vector<2x2xf32> to vector<2x2x1xf32>
    %43 = vector.broadcast %42 : vector<2x2x1xf32> to vector<2x2x32xf32>
    %44 = arith.mulf %9, %43 : vector<2x2x32xf32>
    %cst_23 = arith.constant dense<0.000000e+00> : vector<2x32xf32>
    %45 = vector.multi_reduction <add>, %44, %cst_23 [1] : vector<2x2x32xf32> to vector<2x32xf32>
    %46 = arith.addf %40, %45 : vector<2x32xf32>
    %47 = vector.extract_strided_slice %35 {offsets = [0, 3], sizes = [2, 4], strides = [1, 1]} : vector<2x7xf32> to vector<2x4xf32>
    %48 = vector.shape_cast %47 : vector<2x4xf32> to vector<2x4x1xf32>
    %49 = vector.broadcast %48 : vector<2x4x1xf32> to vector<2x4x32xf32>
    %50 = arith.mulf %6, %49 : vector<2x4x32xf32>
    %cst_24 = arith.constant dense<0.000000e+00> : vector<2x32xf32>
    %51 = vector.multi_reduction <add>, %50, %cst_24 [1] : vector<2x4x32xf32> to vector<2x32xf32>
    %52 = arith.addf %46, %51 : vector<2x32xf32>
    %cst_25 = arith.constant dense<0.000000e+00> : vector<2x128xf32>
    %53 = tpu.matmul %52, %2, %cst_25 {dimension_numbers = #tpu.dot_dimension_numbers<[1], [0], [0], [1], [0, 0, 1, 1], [], []>} : vector<2x32xf32>, vector<32x128xf32>, vector<2x128xf32> -> vector<2x128xf32>
    %54 = vector.broadcast %3 : vector<1x128xf32> to vector<2x128xf32>
    %55 = arith.addf %53, %54 : vector<2x128xf32>
    %c0_26 = arith.constant 0 : index
    %c0_27 = arith.constant 0 : index
    %56 = vector.load %arg6[%c0_26, %c0_27] : memref<2x128xf32, #tpu.memory_space<vmem>>, vector<2x128xf32>
    tpu.vector_store %arg6[%c0_26, %c0_27], %55 {strides = array<i32>} : memref<2x128xf32, #tpu.memory_space<vmem>>, vector<2x128xf32>,
    return
  }
  func.func @transform_0(%arg0: i32) -> (i32, i32, i32) {
    %c0_i32 = arith.constant 0 : i32
    %c0_i32_0 = arith.constant 0 : i32
    %c0_i32_1 = arith.constant 0 : i32
    return %arg0, %c0_i32, %c0_i32_0 : i32, i32, i32
  }
  func.func @transform_1(%arg0: i32) -> (i32, i32) {
    %c0_i32 = arith.constant 0 : i32
    %c0_i32_0 = arith.constant 0 : i32
    %c0_i32_1 = arith.constant 0 : i32
    return %c0_i32, %c0_i32_0 : i32, i32
  }
  func.func @transform_2(%arg0: i32) -> (i32, i32) {
    %c0_i32 = arith.constant 0 : i32
    %c0_i32_0 = arith.constant 0 : i32
    %c0_i32_1 = arith.constant 0 : i32
    return %c0_i32, %c0_i32_0 : i32, i32
  }
  func.func @transform_3(%arg0: i32) -> (i32, i32) {
    %c0_i32 = arith.constant 0 : i32
    %c0_i32_0 = arith.constant 0 : i32
    %c0_i32_1 = arith.constant 0 : i32
    return %c0_i32, %c0_i32_0 : i32, i32
  }
  func.func @transform_4(%arg0: i32) -> (i32, i32) {
    %c0_i32 = arith.constant 0 : i32
    %c0_i32_0 = arith.constant 0 : i32
    %c0_i32_1 = arith.constant 0 : i32
    return %c0_i32, %c0_i32_0 : i32, i32
  }
  func.func @transform_5(%arg0: i32) -> (i32, i32) {
    %c0_i32 = arith.constant 0 : i32
    %c0_i32_0 = arith.constant 0 : i32
    return %arg0, %c0_i32 : i32, i32
  }
}

</mosaic_0001>

<bundles_post_ra>
// kernel: tpu_custom_call.1
= control target key start
LH: loop header
LB: loop body
LE: loop exit
PB: predicated region body
PF: predicated region fallthrough
CT: control target
= control target key end

     0   :  { %10 = vsyncpa [#allocation3], 0  ;;  %s785_s0 = inlined_call_operand.vmem [shape: f32[2,8,32], index: 0, kind: input, shape index: {}]   ;;  %s786_s1 = inlined_call_operand.hbm [shape: f32[7,28], index: 1, kind: input, shape index: {}]   ;;  %s787_s2 = inlined_call_operand.vmem [shape: f32[28,7], index: 2, kind: input, shape index: {}]   ;;  %s788_s3 = inlined_call_operand.vmem [shape: f32[32,128], index: 3, kind: input, shape index: {}]   ;;  %s789_s4 = inlined_call_operand.vmem [shape: f32[1,128], index: 4, kind: input, shape index: {}]   ;;  %s790_s5 = inlined_call_operand.hbm [shape: f32[2,128], index: 5, kind: output, shape index: {}]  }
   0x1   :  { %11 = vsyncpa [#allocation4], 0  ;;  %s621_s18 = smov [#allocation2]   ;;  %s573_s22 = scalar_lea.hbm %s786_s1, 128 }
   0x2   :  { %s20_s19 = sshll.u32 %s621_s18, 4  ;;  %p574_p0 = scmp.ne.s32.totalorder %s786_s1, %s573_s22  ;;  %s21_s19 = int_to_ptr.vmem [resolvable:$true] %s20_s19 }
   0x3   :  { %p577_p1 = scmp.lt.u32.totalorder %s573_s22, %s786_s1 }
   0x5   :  { %p579_p2 = pnand %p577_p1, %p574_p0 }
   0x7   :  { %582 = shalt.err (!%p579_p2)
}
   0x8   :  { %s583_s27 = scalar_lea.vmem %s21_s19, 128  ;;  %p588_p4 = scmp.lt.s32.totalorder %s21_s19, %s21_s19 }
   0x9   :  { %p584_p3 = scmp.ne.s32.totalorder %s21_s19, %s583_s27  ;;  %p589_p5 = scmp.lt.s32.totalorder %s583_s27, %s583_s27 }
   0xb   :  { %p590_p6 = por %p589_p5, %p588_p4 }
   0xd   :  { %p591_p7 = pnand %p590_p6, %p584_p3 }
   0xf   :  { %594 = shalt.err (!%p591_p7)
}
  0x10   :  { %23 = dma.hbm_to_vmem [thread:$0]  %s786_s1, 128, %s21_s19, [#allocation3]  }
  0x11   :  { %617 = dma.done.wait [#allocation3], 128  }
  0x12   :  { %618 = vsyncadd [#allocation3], 4294967168  ;;  %vm83_vm0 = vcmask 257024   ;;  %v43_v0 = vld [vmem:[%s785_s0] sm:$0xf]  ;;  %vm74_vm1 = vcmask 254976   ;;  %v100_v26 = vlaneseq }
  0x13   :  { %v45_v1 = vld [vmem:[%s785_s0 + $0x4] sm:$0xf]  ;;  %v44_v2 = vld [vmem:[%s785_s0 + $0x8] sm:$0xf]  ;;  %v46_v4 = vld [vmem:[%s785_s0 + $0xc] sm:$0xf] }
  0x14   :  { %v680_v3 = vmax.f32 %v43_v0, %v45_v1  ;;  %v685_v5 = vmax.f32 %v44_v2, %v46_v4  ;;  %vm65_vm2 = vcmask 253952   ;;  %v33_v20 = vld [vmem:[#allocation2] sm:$0x7f]  ;;  %vm134_vm3 = vcmask 1046528   ;;  %v35_v23 = vld [vmem:[%s787_s2 + $0x8] sm:$0xff]  ;;  %v36_v55 = vld [vmem:[%s787_s2 + $0x10] sm:$0xff] }
  0x15   :  { %v622_v21 = vmov 0.0   ;;  %vm623_vm4 = vmmov 0   ;;  %v34_v22 = vld [vmem:[%s787_s2] sm:$0xff]  ;;  %v624_v24 = vmov 0.0|0.0   ;;  %v101_v28 = vand.u32 127, %v100_v26  ;;  %s628_s27 = smov [#allocation5]  }
  0x16   :  { %v84_v6 = vsel %vm83_vm0, %v680_v3, 0.0  ;;  %v51_v7 = vrot.slane %v680_v3, 2  ;;  %v52_v8 = vrot.slane %v685_v5, 2  ;;  %v87_v19 = vsel %vm83_vm0, %v685_v5, 0.0  ;;  %519 = vmatprep.subr.mxu0 %v622_v21  ;;  %521 = vmatprep.mubr.msk.f32.mxu0 %vm623_vm4, %v622_v21  ;;  %v37_v56 = vld [vmem:[%s787_s2 + $0x18] sm:$0xf] }
  0x17   :  { %85 = vadd.xlane.f32.xlu1 %v84_v6  ;;  %520 = vmatpush3.msk.msra.mxu0 %vm134_vm3, %v33_v20  ;;  %v547_v25 = vpack.c.bf16 %v35_v23, %v34_v22  ;;  %v724_v30 = vshrl.u32 %v100_v26, 7  ;;  %v102_v31 = vadd.s32 4294967295, %v101_v28  ;;  %v115_v33 = vadd.s32 4294967293, %v101_v28  ;;  %v38_v28 = vld [vmem:[%s788_s3] sm:$0xff]  ;;  %s492_s28 = sshll.u32 %s628_s27, 4  ;;  %s493_s28 = int_to_ptr.vmem [resolvable:$true] %s492_s28 }
  0x18   :  { %v692_v9 = vmax.f32 %v680_v3, %v51_v7  ;;  %v695_v10 = vmax.f32 %v685_v5, %v52_v8  ;;  %532 = vmatprep.mubr.msk.f32.mxu1 %vm623_vm4, %v622_v21  ;;  %546 = vmatprep.subr.bf16.mxu1 %v624_v24  ;;  %vm95_vm5 = vcmask 1041409   ;;  %vm126_vm6 = vcmask 7168   ;;  %s595_s29 = scalar_lea.vmem %s493_s28, 32  ;;  %p600_p9 = scmp.lt.s32.totalorder %s493_s28, %s493_s28 }
  0x19   :  { %553 = vmatprep.subr.bf16.mxu0 %v624_v24  ;;  %548 = vmatpush3.bf16.msra.mxu1 %v547_v25  ;;  %v105_v34 = vsub.s32 %v102_v31, %v724_v30  ;;  %v118_v41 = vsub.s32 %v115_v33, %v724_v30  ;;  %vm128_vm7 = vcmask 23552   ;;  %vm130_vm8 = vcmask 56320   ;;  %v40_v31 = vld [vmem:[%s788_s3 + $0x10] sm:$0xff]  ;;  %p596_p8 = scmp.ne.s32.totalorder %s493_s28, %s595_s29  ;;  %p601_p10 = scmp.lt.s32.totalorder %s595_s29, %s595_s29 }
  0x1a   :  { %v75_v11 = vsel %vm74_vm1, %v692_v9, 0.0  ;;  %v59_v12 = vrot.slane %v692_v9, 1  ;;  %v78_v13 = vsel %vm74_vm1, %v695_v10, 0.0  ;;  %v60_v14 = vrot.slane %v695_v10, 1  ;;  %549 = vmatprep.subr.bf16.mxu1 %v624_v24 }
  0x1b   :  { %76 = vadd.xlane.f32.xlu0 %v75_v11  ;;  %79 = vadd.xlane.f32.xlu1 %v78_v13  ;;  %vm213_vm9 = vcmask 1043456   ;;  %v550_v57 = vpack.c.bf16 %v37_v56, %v36_v55  ;;  %vm625_vm10 = vmmov 1   ;;  %vm209_vm12 = vcmask 228352   ;;  %p602_p11 = por %p601_p10, %p600_p9 }
  0x1c   :  { %v704_v15 = vmax.f32 %v692_v9, %v59_v12  ;;  %v707_v16 = vmax.f32 %v695_v10, %v60_v14  ;;  %vm551_vm11 = vmpackc.low %vm213_vm9, %vm625_vm10  ;;  %vm287_vm13 = vcmask 50176   ;;  %v626_v7 = vmov 0  }
  0x1d   :  { %552 = vmatpush3.bf16.msk.msra.mxu1 %vm551_vm11, %v550_v57  ;;  %567 = vset.pattern.permute.xlu1 %v626_v7  ;;  %v627_v11 = vmov 1966171168   ;;  %v352_v14 = vsub.s32 1, %v724_v30  ;;  %vm412_vm14 = vcmask 261120   ;;  %p603_p12 = pnand %p602_p11, %p596_p8 }
  0x1e   :  { %v66_v17 = vsel %vm65_vm2, %v704_v15, 0.0  ;;  %v69_v18 = vsel %vm65_vm2, %v707_v16, 0.0  ;;  %568 = vset.pattern.permute.xlu0 %v626_v7  ;;  %v301_v12 = vunpack.c.l.s4 %v627_v11 }
  0x1f   :  { %70 = vadd.xlane.f32.xlu0 %v69_v18  ;;  %67 = vadd.xlane.f32.xlu1 %v66_v17  ;;  %v740_v17 = vsub.s32 0, %v724_v30 }
  0x20   :  { %v302_v13 = vunpack.c.0.s8 %v301_v12 }
  0x22   :  { %v305_v18 = vsub.s32 %v302_v13, %v724_v30 }
  0x23   :  { %88 = vadd.xlane.f32.xlu0 %v87_v19 }
  0xa4   :  { %v86_v27 = vpop.xlane.xlu1 %85 }
  0xa5   :  { %v90_v42 = vmul.f32 0.03125, %v86_v27 }
  0xa7   :  { %v119_v49 = vrot.slane %v90_v42, %v118_v41 }
  0xa8   :  { %v77_v29 = vpop.xlane.xlu0 %76  ;;  %v80_v32 = vpop.xlane.xlu1 %79 }
  0xa9   :  { %v82_v35 = vmul.f32 0.03125, %v80_v32  ;;  %v81_v36 = vmul.f32 0.03125, %v77_v29  ;;  %v39_v29 = vld [vmem:[%s788_s3 + $0x8] sm:$0xff]  ;;  %v41_v32 = vld [vmem:[%s788_s3 + $0x18] sm:$0xff] }
  0xaa   :  { %v554_v30 = vpack.c.bf16 %v39_v29, %v38_v28  ;;  %v557_v33 = vpack.c.bf16 %v41_v32, %v40_v31 }
  0xab   :  { %v110_v44 = vrot.slane %v82_v35, %v105_v34  ;;  %v106_v45 = vrot.slane %v81_v36, %v105_v34 }
  0xac   :  { %v71_v37 = vpop.xlane.xlu0 %70  ;;  %v68_v38 = vpop.xlane.xlu1 %67 }
  0xad   :  { %v73_v39 = vmul.f32 0.03125, %v71_v37  ;;  %v72_v40 = vmul.f32 0.03125, %v68_v38  ;;  %v111_v51 = vsel %vm95_vm5, %v110_v44, %v106_v45 }
  0xaf   :  { %v94_v43 = vrot.slane %v73_v39, 7 }
  0xb0   :  { %v89_v46 = vpop.xlane.xlu0 %88 }
  0xb1   :  { %v91_v47 = vmul.f32 0.03125, %v89_v46  ;;  %v96_v48 = vsel %vm95_vm5, %v94_v43, %v72_v40 }
  0xb2   :  { %v127_v53 = vsel %vm126_vm6, %v96_v48, %v111_v51 }
  0xb3   :  { %v123_v50 = vrot.slane %v91_v47, %v118_v41 }
  0xb5   :  { %v124_v52 = vsel %vm95_vm5, %v123_v50, %v119_v49 }
  0xb6   :  { %v129_v54 = vsel %vm128_vm7, %v127_v53, %v124_v52 }
  0xb7   :  { %522 = vmatmul.mubr.msk.f32.vlgmr.msra.gmra.mrb[0].mxu0 %vm130_vm8, %v129_v54 }
  0xb8   :  { %543 = vmatprep.mubr.msk.f32.mxu0 %vm623_vm4, %v622_v21  ;;  %555 = vmatpush3.bf16.msra.mxu0 %v554_v30 }
  0xb9   :  { %556 = vmatprep.subr.bf16.mxu0 %v624_v24 }
  0xbc   :  { %558 = vmatpush3.bf16.msra.mxu0 %v557_v33 }
 0x18a   :  { %v204_v58 = vpop.f32.mrb[0].mxu0 }
 0x18b   :  { %v208_v59 = vmax.f32 %v204_v58, 0.0  ;;  %v523_v60 = vpop.f32.mrb[1].mxu0 }
 0x18d   :  { %533 = vmatmul.mubr.msk.f32.vlgmr.msra.gmra.mrb[0].mxu1 %vm209_vm12, %v208_v59 }
 0x260   :  { %v283_v61 = vpop.f32.mrb[0].mxu1 }
 0x261   :  { %v534_v62 = vpop.f32.mrb[1].mxu1  ;;  %v288_v63 = vsel %vm287_vm13, %v283_v61, -inf }
 0x262   :  { %289 = vmax.xlane.f32.xlu0 %v288_v63 }
 0x2ef   :  { %v290_v0 = vpop.xlane.xlu0 %289 }
 0x2f0   :  { %v291_v1 = vsub.f32 %v283_v61, %v290_v0 }
 0x2f2   :  { %v292_v2 = vmul.f32 1.442695, %v291_v1 }
 0x2f4   :  { %569 = vpow2.f32 %v292_v2 }
 0x2fe   :  { %v570_v4 = vpop.eup %569 }
 0x2ff   :  { %v294_v6 = vsel %vm287_vm13, %v570_v4, 0.0 }
 0x300   :  { %295 = vadd.xlane.f32.xlu1 %v294_v6 }
 0x38d   :  { %v296_v8 = vpop.xlane.xlu1 %295 }
 0x38e   :  { %571 = vrcp.f32 %v296_v8 }
 0x398   :  { %v572_v19 = vpop.eup %571 }
 0x399   :  { %v298_v20 = vmul.f32 %v572_v19, %v570_v4 }
 0x39b   :  { %v353_v21 = vrot.slane %v298_v20, %v352_v14  ;;  %v345_v22 = vrot.slane %v298_v20, %v740_v17  ;;  %v306_v23 = vrot.slane %v298_v20, %v305_v18 }
 0x39d   :  { %356 = vbcast.lane.b32.xlu0 %v353_v21, 257  ;;  %348 = vbcast.lane.b32.xlu1 %v345_v22, 257  ;;  %v307_v25 = vcombine.high %v306_v23, %v306_v23  ;;  %v314_v27 = vrot.slane %v306_v23, %v305_v18 }
 0x39f   :  { %v321_v26 = vrot.slane %v307_v25, %v305_v18 }
 0x3a1   :  { %378 = vbcast.lane.b32.xlu0 %v345_v22, 259  ;;  %382 = vbcast.lane.b32.xlu1 %v353_v21, 259 }
 0x3a5   :  { %331 = vperm.xlu1 %567, %v321_v26  }
 0x3a9   :  { %323 = vperm.xlu1 %567, %v314_v27  }
 0x40f   :  { %v357_v34 = vpop.permute.xlu0 %356  ;;  %v349_v35 = vpop.permute.xlu1 %348 }
 0x410   :  { %v359_v36 = vmul.f32 %v357_v34, %v695_v10  ;;  %v358_v37 = vmul.f32 %v349_v35, %v692_v9 }
 0x412   :  { %v367_v38 = vsel %vm74_vm1, %v359_v36, 0.0  ;;  %v360_v41 = vsel %vm74_vm1, %v358_v37, 0.0 }
 0x413   :  { %v368_v39 = vrot.slane %v367_v38, 4  ;;  %v379_v24 = vpop.permute.xlu0 %378  ;;  %v383_v40 = vpop.permute.xlu1 %382  ;;  %v361_v47 = vrot.slane %v360_v41, 4 }
 0x414   :  { %v384_v42 = vmul.f32 %v379_v24, %v680_v3  ;;  %v385_v43 = vmul.f32 %v383_v40, %v685_v5 }
 0x415   :  { %v369_v46 = vadd.f32 %v368_v39, %v367_v38  ;;  %v362_v50 = vadd.f32 %v361_v47, %v360_v41 }
 0x416   :  { %v386_v44 = vsel %vm83_vm0, %v384_v42, 0.0  ;;  %v393_v45 = vsel %vm83_vm0, %v385_v43, 0.0 }
 0x417   :  { %v394_v10 = vrot.slane %v393_v45, 4  ;;  %v387_v48 = vrot.slane %v386_v44, 4  ;;  %v370_v49 = vrot.slane %v369_v46, 2  ;;  %v363_v54 = vrot.slane %v362_v50, 2 }
 0x419   :  { %v395_v9 = vadd.f32 %v394_v10, %v393_v45  ;;  %v388_v51 = vadd.f32 %v387_v48, %v386_v44  ;;  %v371_v53 = vadd.f32 %v370_v49, %v369_v46  ;;  %v364_v57 = vadd.f32 %v363_v54, %v362_v50 }
 0x41b   :  { %v396_v52 = vrot.slane %v395_v9, 2  ;;  %v389_v55 = vrot.slane %v388_v51, 2  ;;  %v372_v3 = vrot.slane %v371_v53, 1  ;;  %v365_v61 = vrot.slane %v364_v57, 1 }
 0x41d   :  { %v397_v56 = vadd.f32 %v396_v52, %v395_v9  ;;  %v390_v58 = vadd.f32 %v389_v55, %v388_v51  ;;  %v373_v62 = vadd.f32 %v372_v3, %v371_v53  ;;  %v366_v8 = vadd.f32 %v365_v61, %v364_v57 }
 0x41f   :  { %v398_v59 = vrot.slane %v397_v56, 1  ;;  %v391_v1 = vrot.slane %v390_v58, 1 }
 0x421   :  { %v399_v2 = vadd.f32 %v398_v59, %v397_v56  ;;  %v392_v12 = vadd.f32 %v391_v1, %v390_v58 }
 0x424   :  { %v332_v5 = vpop.permute.xlu1 %331 }
 0x425   :  { %v337_v60 = vrot.slane %v332_v5, %v740_v17 }
 0x427   :  { %v339_v63 = vmul.f32 %v337_v60, %v707_v16  ;;  %v505_v16 = vld [vmem:[%s789_s4] ss:$0 sm:$0xff] }
 0x428   :  { %v324_v0 = vpop.permute.xlu1 %323 }
 0x429   :  { %v375_v4 = vadd.f32 %v373_v62, %v339_v63  ;;  %v329_v6 = vrot.slane %v324_v0, %v740_v17 }
 0x42b   :  { %v401_v7 = vadd.f32 %v399_v2, %v375_v4  ;;  %v338_v11 = vmul.f32 %v329_v6, %v704_v15 }
 0x42d   :  { %v374_v13 = vadd.f32 %v366_v8, %v338_v11  ;;  %v410_v14 = vrot.slane %v401_v7, 7 }
 0x42f   :  { %v400_v18 = vadd.f32 %v392_v12, %v374_v13 }
 0x431   :  { %v411_v19 = vsel %vm95_vm5, %v410_v14, %v400_v18 }
 0x432   :  { %544 = vmatmul.mubr.msk.f32.vlgmr.msra.gmra.mrb[2].mxu0 %vm412_vm14, %v411_v19 }
 0x505   :  { %v481_v20 = vpop.f32.mrb[2].mxu0 }
 0x506   :  { %v482_v17 = vadd.f32 %v505_v16, %v481_v20  ;;  %v545_v21 = vpop.f32.mrb[3].mxu0 }
 0x508   :  { %485 = vst [vmem:[#allocation5] sm:$0x3] %v482_v17 }
 0x509   :  { %606 = shalt.err (!%p603_p12)
}
 0x50a   :  { %s607_s7 = scalar_lea.hbm %s790_s5, 32 }
 0x50b   :  { %p608_p13 = scmp.ne.s32.totalorder %s790_s5, %s607_s7  ;;  %p611_p0 = scmp.lt.u32.totalorder %s607_s7, %s790_s5 }
 0x50d   :  { %p613_p1 = pnand %p611_p0, %p608_p13 }
 0x50f   :  { %616 = shalt.err (!%p613_p1)
}
 0x510   :  { %495 = dma.vmem_to_hbm [thread:$0]  %s493_s28, 32, %s790_s5, [#allocation4]  }
 0x511   :  { %619 = dma.done.wait [#allocation4], 32  }
 0x512   :  { %620 = vsyncadd [#allocation4], 4294967264 }
 0x513   :  { %499 = vsyncpa [#allocation3], 1 }
 0x514   :  { %500 = vsyncpa [#allocation4], 1 }

// kernel: tpu_custom_call.1
= control target key start
LH: loop header
LB: loop body
LE: loop exit
PB: predicated region body
PF: predicated region fallthrough
CT: control target
= control target key end

     0   :  { %10 = vsyncpa [#allocation3], 0  ;;  %s785_s0 = inlined_call_operand.vmem [shape: f32[2,8,32], index: 0, kind: input, shape index: {}]   ;;  %s786_s1 = inlined_call_operand.hbm [shape: f32[7,28], index: 1, kind: input, shape index: {}]   ;;  %s787_s2 = inlined_call_operand.vmem [shape: f32[28,7], index: 2, kind: input, shape index: {}]   ;;  %s788_s3 = inlined_call_operand.vmem [shape: f32[32,128], index: 3, kind: input, shape index: {}]   ;;  %s789_s4 = inlined_call_operand.vmem [shape: f32[1,128], index: 4, kind: input, shape index: {}]   ;;  %s790_s5 = inlined_call_operand.hbm [shape: f32[2,128], index: 5, kind: output, shape index: {}]  }
   0x1   :  { %11 = vsyncpa [#allocation4], 0  ;;  %s621_s18 = smov [#allocation2]   ;;  %s573_s22 = scalar_lea.hbm %s786_s1, 128 }
   0x2   :  { %s20_s19 = sshll.u32 %s621_s18, 4  ;;  %p574_p0 = scmp.ne.s32.totalorder %s786_s1, %s573_s22  ;;  %s21_s19 = int_to_ptr.vmem [resolvable:$true] %s20_s19 }
   0x3   :  { %p577_p1 = scmp.lt.u32.totalorder %s573_s22, %s786_s1 }
   0x5   :  { %p579_p2 = pnand %p577_p1, %p574_p0 }
   0x7   :  { %582 = shalt.err (!%p579_p2)
}
   0x8   :  { %s583_s27 = scalar_lea.vmem %s21_s19, 128  ;;  %p588_p4 = scmp.lt.s32.totalorder %s21_s19, %s21_s19 }
   0x9   :  { %p584_p3 = scmp.ne.s32.totalorder %s21_s19, %s583_s27  ;;  %p589_p5 = scmp.lt.s32.totalorder %s583_s27, %s583_s27 }
   0xb   :  { %p590_p6 = por %p589_p5, %p588_p4 }
   0xd   :  { %p591_p7 = pnand %p590_p6, %p584_p3 }
   0xf   :  { %594 = shalt.err (!%p591_p7)
}
  0x10   :  { %23 = dma.hbm_to_vmem [thread:$0]  %s786_s1, 128, %s21_s19, [#allocation3]  }
  0x11   :  { %617 = dma.done.wait [#allocation3], 128  }
  0x12   :  { %618 = vsyncadd [#allocation3], 4294967168  ;;  %vm83_vm0 = vcmask 257024   ;;  %v43_v0 = vld [vmem:[%s785_s0] sm:$0xf]  ;;  %vm74_vm1 = vcmask 254976   ;;  %v100_v26 = vlaneseq }
  0x13   :  { %v45_v1 = vld [vmem:[%s785_s0 + $0x4] sm:$0xf]  ;;  %v44_v2 = vld [vmem:[%s785_s0 + $0x8] sm:$0xf]  ;;  %v46_v4 = vld [vmem:[%s785_s0 + $0xc] sm:$0xf] }
  0x14   :  { %v680_v3 = vmax.f32 %v43_v0, %v45_v1  ;;  %v685_v5 = vmax.f32 %v44_v2, %v46_v4  ;;  %vm65_vm2 = vcmask 253952   ;;  %v33_v20 = vld [vmem:[#allocation2] sm:$0x7f]  ;;  %vm134_vm3 = vcmask 1046528   ;;  %v35_v23 = vld [vmem:[%s787_s2 + $0x8] sm:$0xff]  ;;  %v36_v55 = vld [vmem:[%s787_s2 + $0x10] sm:$0xff] }
  0x15   :  { %v622_v21 = vmov 0.0   ;;  %vm623_vm4 = vmmov 0   ;;  %v34_v22 = vld [vmem:[%s787_s2] sm:$0xff]  ;;  %v624_v24 = vmov 0.0|0.0   ;;  %v101_v28 = vand.u32 127, %v100_v26  ;;  %s628_s27 = smov [#allocation5]  }
  0x16   :  { %v84_v6 = vsel %vm83_vm0, %v680_v3, 0.0  ;;  %v51_v7 = vrot.slane %v680_v3, 2  ;;  %v52_v8 = vrot.slane %v685_v5, 2  ;;  %v87_v19 = vsel %vm83_vm0, %v685_v5, 0.0  ;;  %519 = vmatprep.subr.mxu0 %v622_v21  ;;  %521 = vmatprep.mubr.msk.f32.mxu0 %vm623_vm4, %v622_v21  ;;  %v37_v56 = vld [vmem:[%s787_s2 + $0x18] sm:$0xf] }
  0x17   :  { %85 = vadd.xlane.f32.xlu1 %v84_v6  ;;  %520 = vmatpush3.msk.msra.mxu0 %vm134_vm3, %v33_v20  ;;  %v547_v25 = vpack.c.bf16 %v35_v23, %v34_v22  ;;  %v724_v30 = vshrl.u32 %v100_v26, 7  ;;  %v102_v31 = vadd.s32 4294967295, %v101_v28  ;;  %v115_v33 = vadd.s32 4294967293, %v101_v28  ;;  %v38_v28 = vld [vmem:[%s788_s3] sm:$0xff]  ;;  %s492_s28 = sshll.u32 %s628_s27, 4  ;;  %s493_s28 = int_to_ptr.vmem [resolvable:$true] %s492_s28 }
  0x18   :  { %v692_v9 = vmax.f32 %v680_v3, %v51_v7  ;;  %v695_v10 = vmax.f32 %v685_v5, %v52_v8  ;;  %532 = vmatprep.mubr.msk.f32.mxu1 %vm623_vm4, %v622_v21  ;;  %546 = vmatprep.subr.bf16.mxu1 %v624_v24  ;;  %vm95_vm5 = vcmask 1041409   ;;  %vm126_vm6 = vcmask 7168   ;;  %s595_s29 = scalar_lea.vmem %s493_s28, 32  ;;  %p600_p9 = scmp.lt.s32.totalorder %s493_s28, %s493_s28 }
  0x19   :  { %553 = vmatprep.subr.bf16.mxu0 %v624_v24  ;;  %548 = vmatpush3.bf16.msra.mxu1 %v547_v25  ;;  %v105_v34 = vsub.s32 %v102_v31, %v724_v30  ;;  %v118_v41 = vsub.s32 %v115_v33, %v724_v30  ;;  %vm128_vm7 = vcmask 23552   ;;  %vm130_vm8 = vcmask 56320   ;;  %v40_v31 = vld [vmem:[%s788_s3 + $0x10] sm:$0xff]  ;;  %p596_p8 = scmp.ne.s32.totalorder %s493_s28, %s595_s29  ;;  %p601_p10 = scmp.lt.s32.totalorder %s595_s29, %s595_s29 }
  0x1a   :  { %v75_v11 = vsel %vm74_vm1, %v692_v9, 0.0  ;;  %v59_v12 = vrot.slane %v692_v9, 1  ;;  %v78_v13 = vsel %vm74_vm1, %v695_v10, 0.0  ;;  %v60_v14 = vrot.slane %v695_v10, 1  ;;  %549 = vmatprep.subr.bf16.mxu1 %v624_v24 }
  0x1b   :  { %76 = vadd.xlane.f32.xlu0 %v75_v11  ;;  %79 = vadd.xlane.f32.xlu1 %v78_v13  ;;  %vm213_vm9 = vcmask 1043456   ;;  %v550_v57 = vpack.c.bf16 %v37_v56, %v36_v55  ;;  %vm625_vm10 = vmmov 1   ;;  %vm209_vm12 = vcmask 228352   ;;  %p602_p11 = por %p601_p10, %p600_p9 }
  0x1c   :  { %v704_v15 = vmax.f32 %v692_v9, %v59_v12  ;;  %v707_v16 = vmax.f32 %v695_v10, %v60_v14  ;;  %vm551_vm11 = vmpackc.low %vm213_vm9, %vm625_vm10  ;;  %vm287_vm13 = vcmask 50176   ;;  %v626_v7 = vmov 0  }
  0x1d   :  { %552 = vmatpush3.bf16.msk.msra.mxu1 %vm551_vm11, %v550_v57  ;;  %567 = vset.pattern.permute.xlu1 %v626_v7  ;;  %v627_v11 = vmov 1966171168   ;;  %v352_v14 = vsub.s32 1, %v724_v30  ;;  %vm412_vm14 = vcmask 261120   ;;  %p603_p12 = pnand %p602_p11, %p596_p8 }
  0x1e   :  { %v66_v17 = vsel %vm65_vm2, %v704_v15, 0.0  ;;  %v69_v18 = vsel %vm65_vm2, %v707_v16, 0.0  ;;  %568 = vset.pattern.permute.xlu0 %v626_v7  ;;  %v301_v12 = vunpack.c.l.s4 %v627_v11 }
  0x1f   :  { %70 = vadd.xlane.f32.xlu0 %v69_v18  ;;  %67 = vadd.xlane.f32.xlu1 %v66_v17  ;;  %v740_v17 = vsub.s32 0, %v724_v30 }
  0x20   :  { %v302_v13 = vunpack.c.0.s8 %v301_v12 }
  0x22   :  { %v305_v18 = vsub.s32 %v302_v13, %v724_v30 }
  0x23   :  { %88 = vadd.xlane.f32.xlu0 %v87_v19 }
  0xa4   :  { %v86_v27 = vpop.xlane.xlu1 %85 }
  0xa5   :  { %v90_v42 = vmul.f32 0.03125, %v86_v27 }
  0xa7   :  { %v119_v49 = vrot.slane %v90_v42, %v118_v41 }
  0xa8   :  { %v77_v29 = vpop.xlane.xlu0 %76  ;;  %v80_v32 = vpop.xlane.xlu1 %79 }
  0xa9   :  { %v82_v35 = vmul.f32 0.03125, %v80_v32  ;;  %v81_v36 = vmul.f32 0.03125, %v77_v29  ;;  %v39_v29 = vld [vmem:[%s788_s3 + $0x8] sm:$0xff]  ;;  %v41_v32 = vld [vmem:[%s788_s3 + $0x18] sm:$0xff] }
  0xaa   :  { %v554_v30 = vpack.c.bf16 %v39_v29, %v38_v28  ;;  %v557_v33 = vpack.c.bf16 %v41_v32, %v40_v31 }
  0xab   :  { %v110_v44 = vrot.slane %v82_v35, %v105_v34  ;;  %v106_v45 = vrot.slane %v81_v36, %v105_v34 }
  0xac   :  { %v71_v37 = vpop.xlane.xlu0 %70  ;;  %v68_v38 = vpop.xlane.xlu1 %67 }
  0xad   :  { %v73_v39 = vmul.f32 0.03125, %v71_v37  ;;  %v72_v40 = vmul.f32 0.03125, %v68_v38  ;;  %v111_v51 = vsel %vm95_vm5, %v110_v44, %v106_v45 }
  0xaf   :  { %v94_v43 = vrot.slane %v73_v39, 7 }
  0xb0   :  { %v89_v46 = vpop.xlane.xlu0 %88 }
  0xb1   :  { %v91_v47 = vmul.f32 0.03125, %v89_v46  ;;  %v96_v48 = vsel %vm95_vm5, %v94_v43, %v72_v40 }
  0xb2   :  { %v127_v53 = vsel %vm126_vm6, %v96_v48, %v111_v51 }
  0xb3   :  { %v123_v50 = vrot.slane %v91_v47, %v118_v41 }
  0xb5   :  { %v124_v52 = vsel %vm95_vm5, %v123_v50, %v119_v49 }
  0xb6   :  { %v129_v54 = vsel %vm128_vm7, %v127_v53, %v124_v52 }
  0xb7   :  { %522 = vmatmul.mubr.msk.f32.vlgmr.msra.gmra.mrb[0].mxu0 %vm130_vm8, %v129_v54 }
  0xb8   :  { %543 = vmatprep.mubr.msk.f32.mxu0 %vm623_vm4, %v622_v21  ;;  %555 = vmatpush3.bf16.msra.mxu0 %v554_v30 }
  0xb9   :  { %556 = vmatprep.subr.bf16.mxu0 %v624_v24 }
  0xbc   :  { %558 = vmatpush3.bf16.msra.mxu0 %v557_v33 }
 0x18a   :  { %v204_v58 = vpop.f32.mrb[0].mxu0 }
 0x18b   :  { %v208_v59 = vmax.f32 %v204_v58, 0.0  ;;  %v523_v60 = vpop.f32.mrb[1].mxu0 }
 0x18d   :  { %533 = vmatmul.mubr.msk.f32.vlgmr.msra.gmra.mrb[0].mxu1 %vm209_vm12, %v208_v59 }
 0x260   :  { %v283_v61 = vpop.f32.mrb[0].mxu1 }
 0x261   :  { %v534_v62 = vpop.f32.mrb[1].mxu1  ;;  %v288_v63 = vsel %vm287_vm13, %v283_v61, -inf }
 0x262   :  { %289 = vmax.xlane.f32.xlu0 %v288_v63 }
 0x2ef   :  { %v290_v0 = vpop.xlane.xlu0 %289 }
 0x2f0   :  { %v291_v1 = vsub.f32 %v283_v61, %v290_v0 }
 0x2f2   :  { %v292_v2 = vmul.f32 1.442695, %v291_v1 }
 0x2f4   :  { %569 = vpow2.f32 %v292_v2 }
 0x2fe   :  { %v570_v4 = vpop.eup %569 }
 0x2ff   :  { %v294_v6 = vsel %vm287_vm13, %v570_v4, 0.0 }
 0x300   :  { %295 = vadd.xlane.f32.xlu1 %v294_v6 }
 0x38d   :  { %v296_v8 = vpop.xlane.xlu1 %295 }
 0x38e   :  { %571 = vrcp.f32 %v296_v8 }
 0x398   :  { %v572_v19 = vpop.eup %571 }
 0x399   :  { %v298_v20 = vmul.f32 %v572_v19, %v570_v4 }
 0x39b   :  { %v353_v21 = vrot.slane %v298_v20, %v352_v14  ;;  %v345_v22 = vrot.slane %v298_v20, %v740_v17  ;;  %v306_v23 = vrot.slane %v298_v20, %v305_v18 }
 0x39d   :  { %356 = vbcast.lane.b32.xlu0 %v353_v21, 257  ;;  %348 = vbcast.lane.b32.xlu1 %v345_v22, 257  ;;  %v307_v25 = vcombine.high %v306_v23, %v306_v23  ;;  %v314_v27 = vrot.slane %v306_v23, %v305_v18 }
 0x39f   :  { %v321_v26 = vrot.slane %v307_v25, %v305_v18 }
 0x3a1   :  { %378 = vbcast.lane.b32.xlu0 %v345_v22, 259  ;;  %382 = vbcast.lane.b32.xlu1 %v353_v21, 259 }
 0x3a5   :  { %331 = vperm.xlu1 %567, %v321_v26  }
 0x3a9   :  { %323 = vperm.xlu1 %567, %v314_v27  }
 0x40f   :  { %v357_v34 = vpop.permute.xlu0 %356  ;;  %v349_v35 = vpop.permute.xlu1 %348 }
 0x410   :  { %v359_v36 = vmul.f32 %v357_v34, %v695_v10  ;;  %v358_v37 = vmul.f32 %v349_v35, %v692_v9 }
 0x412   :  { %v367_v38 = vsel %vm74_vm1, %v359_v36, 0.0  ;;  %v360_v41 = vsel %vm74_vm1, %v358_v37, 0.0 }
 0x413   :  { %v368_v39 = vrot.slane %v367_v38, 4  ;;  %v379_v24 = vpop.permute.xlu0 %378  ;;  %v383_v40 = vpop.permute.xlu1 %382  ;;  %v361_v47 = vrot.slane %v360_v41, 4 }
 0x414   :  { %v384_v42 = vmul.f32 %v379_v24, %v680_v3  ;;  %v385_v43 = vmul.f32 %v383_v40, %v685_v5 }
 0x415   :  { %v369_v46 = vadd.f32 %v368_v39, %v367_v38  ;;  %v362_v50 = vadd.f32 %v361_v47, %v360_v41 }
 0x416   :  { %v386_v44 = vsel %vm83_vm0, %v384_v42, 0.0  ;;  %v393_v45 = vsel %vm83_vm0, %v385_v43, 0.0 }
 0x417   :  { %v394_v10 = vrot.slane %v393_v45, 4  ;;  %v387_v48 = vrot.slane %v386_v44, 4  ;;  %v370_v49 = vrot.slane %v369_v46, 2  ;;  %v363_v54 = vrot.slane %v362_v50, 2 }
 0x419   :  { %v395_v9 = vadd.f32 %v394_v10, %v393_v45  ;;  %v388_v51 = vadd.f32 %v387_v48, %v386_v44  ;;  %v371_v53 = vadd.f32 %v370_v49, %v369_v46  ;;  %v364_v57 = vadd.f32 %v363_v54, %v362_v50 }
 0x41b   :  { %v396_v52 = vrot.slane %v395_v9, 2  ;;  %v389_v55 = vrot.slane %v388_v51, 2  ;;  %v372_v3 = vrot.slane %v371_v53, 1  ;;  %v365_v61 = vrot.slane %v364_v57, 1 }
 0x41d   :  { %v397_v56 = vadd.f32 %v396_v52, %v395_v9  ;;  %v390_v58 = vadd.f32 %v389_v55, %v388_v51  ;;  %v373_v62 = vadd.f32 %v372_v3, %v371_v53  ;;  %v366_v8 = vadd.f32 %v365_v61, %v364_v57 }
 0x41f   :  { %v398_v59 = vrot.slane %v397_v56, 1  ;;  %v391_v1 = vrot.slane %v390_v58, 1 }
 0x421   :  { %v399_v2 = vadd.f32 %v398_v59, %v397_v56  ;;  %v392_v12 = vadd.f32 %v391_v1, %v390_v58 }
 0x424   :  { %v332_v5 = vpop.permute.xlu1 %331 }
 0x425   :  { %v337_v60 = vrot.slane %v332_v5, %v740_v17 }
 0x427   :  { %v339_v63 = vmul.f32 %v337_v60, %v707_v16  ;;  %v505_v16 = vld [vmem:[%s789_s4] ss:$0 sm:$0xff] }
 0x428   :  { %v324_v0 = vpop.permute.xlu1 %323 }
 0x429   :  { %v375_v4 = vadd.f32 %v373_v62, %v339_v63  ;;  %v329_v6 = vrot.slane %v324_v0, %v740_v17 }
 0x42b   :  { %v401_v7 = vadd.f32 %v399_v2, %v375_v4  ;;  %v338_v11 = vmul.f32 %v329_v6, %v704_v15 }
 0x42d   :  { %v374_v13 = vadd.f32 %v366_v8, %v338_v11  ;;  %v410_v14 = vrot.slane %v401_v7, 7 }
 0x42f   :  { %v400_v18 = vadd.f32 %v392_v12, %v374_v13 }
 0x431   :  { %v411_v19 = vsel %vm95_vm5, %v410_v14, %v400_v18 }
 0x432   :  { %544 = vmatmul.mubr.msk.f32.vlgmr.msra.gmra.mrb[2].mxu0 %vm412_vm14, %v411_v19 }
 0x505   :  { %v481_v20 = vpop.f32.mrb[2].mxu0 }
 0x506   :  { %v482_v17 = vadd.f32 %v505_v16, %v481_v20  ;;  %v545_v21 = vpop.f32.mrb[3].mxu0 }
 0x508   :  { %485 = vst [vmem:[#allocation5] sm:$0x3] %v482_v17 }
 0x509   :  { %606 = shalt.err (!%p603_p12)
}
 0x50a   :  { %s607_s7 = scalar_lea.hbm %s790_s5, 32 }
 0x50b   :  { %p608_p13 = scmp.ne.s32.totalorder %s790_s5, %s607_s7  ;;  %p611_p0 = scmp.lt.u32.totalorder %s607_s7, %s790_s5 }
 0x50d   :  { %p613_p1 = pnand %p611_p0, %p608_p13 }
 0x50f   :  { %616 = shalt.err (!%p613_p1)
}
 0x510   :  { %495 = dma.vmem_to_hbm [thread:$0]  %s493_s28, 32, %s790_s5, [#allocation4]  }
 0x511   :  { %619 = dma.done.wait [#allocation4], 32  }
 0x512   :  { %620 = vsyncadd [#allocation4], 4294967264 }
 0x513   :  { %499 = vsyncpa [#allocation3], 1 }
 0x514   :  { %500 = vsyncpa [#allocation4], 1 }

</bundles_post_ra>
